<compile_context>
chip_gen: v6e
topology: v6e:2x2x1
jax: 0.10.0
libtpu: 0.0.40
codegen_flags: <defaults>
</compile_context>

<pallas_src>
import functools

import jax
import jax.numpy as jnp
from jax import lax
from jax.experimental import pallas as pl
from jax.experimental.pallas import tpu as pltpu

_D = 6  # 6-DoF pose: [xyz | log-q]


def _paper_criterion_kernel(pred_ref, targ_ref, scal_ref, o_ref, *, N, T, width):
    W = T * _D               # lane width of the (N, T*6) layout
    vos_w = (T - 1) * _D     # number of valid VO columns per row
    num_poses = N * T
    inv_3nt = 1.0 / (3.0 * num_poses)                # denom for the three [:, :3]-style means
    inv_rel_rot = 1.0 / ((width - 3.0) * num_poses)  # denom for the vos [:, 3:] mean

    p = pred_ref[...].astype(jnp.float32)            # (N, T*6), cast in-kernel
    t = targ_ref[...].astype(jnp.float32)
    d = p - t
    ad = jnp.abs(d)

    # ---- absolute pose loss ------------------------------------------------
    # pos columns are the first 3 of every group of 6 lanes; build the 0/1
    # mask with T exact integer compares (trace-time unrolled, T <= 6).
    col = lax.broadcasted_iota(jnp.int32, (N, W), 1)
    pos_m = jnp.zeros((N, W), jnp.float32)
    for tt in range(T):
        lo = tt * _D
        pos_m = pos_m + ((col >= lo) & (col < lo + 3)).astype(jnp.float32)

    sum_ad = jnp.sum(ad)
    sum_ad_pos = jnp.sum(ad * pos_m)
    abs_pos = sum_ad_pos * inv_3nt
    abs_rot = (sum_ad - sum_ad_pos) * inv_3nt        # rot = total - pos

    # ---- relative (VO) loss: calc_vos_simple == temporal differences -------
    # |pred_vos - targ_vos| = |(p[:,t+1]-p[:,t]) - (targ[:,t+1]-targ[:,t])|
    # In the lane-dense layout this is a static lane-slice difference.
    # TODO(synk): for large T prefer pltpu.roll(d, -6, axis=1) - d + tail mask.
    vd = d[:, _D:] - d[:, :vos_w]                    # (N, (T-1)*6)
    avd = jnp.abs(vd)
    # Replicate the reference's .view(N*T, -1) regrouping of the vos tensor:
    # element (n, c) has flat index n*vos_w + c, and since width | vos_w the
    # "pos" columns are simply c mod width < 3 — again T exact compares.
    c2 = lax.broadcasted_iota(jnp.int32, (N, vos_w), 1)
    vpos_m = jnp.zeros((N, vos_w), jnp.float32)
    for tt in range(T):
        lo = tt * width
        vpos_m = vpos_m + ((c2 >= lo) & (c2 < lo + 3)).astype(jnp.float32)

    sum_avd = jnp.sum(avd)
    sum_avd_pos = jnp.sum(avd * vpos_m)
    rel_pos = sum_avd_pos * inv_3nt
    rel_rot = (sum_avd - sum_avd_pos) * inv_rel_rot  # rot = total - pos

    # ---- scalar tail: exp(-beta)/exp(-gamma) weighting (pure scalar math) ---
    beta = scal_ref[0]
    gamma = scal_ref[1]
    e_nb = scal_ref[2]     # exp(-beta), precomputed in the wrapper
    e_ng = scal_ref[3]     # exp(-gamma)
    alpha = scal_ref[4]

    abs_loss = e_nb * abs_pos + beta + e_ng * abs_rot + gamma
    rel_loss = e_nb * rel_pos + beta + e_ng * rel_rot + gamma
    loss = abs_loss + alpha * rel_loss
    o_ref[...] = jnp.broadcast_to(loss, (1, 1))


def paper_criterion(pred, targ, *, beta=0.0, gamma=-3.0, alpha=1.0):
    """Pallas implementation of PaperCriterion.forward (L1Loss, reduction='mean')."""
    N, T, D = pred.shape
    assert D == _D
    num_poses = N * T
    vos_elems = N * (T - 1) * D
    # The reference reshapes the (N, T-1, 6) vos tensor with .view(N*T, -1);
    # that only works when T | 6.  We mirror that regrouping bug-for-bug.
    assert vos_elems % num_poses == 0, "T must divide 6 (implied by .view(N*T, -1))"
    width = vos_elems // num_poses
    assert width > 3, "[:, 3:] slice of the vos view would be empty (NaN in PyTorch)"

    # Lane-dense presentation: (N, T*6).  Row-major contiguous => free reshape.
    pred2 = pred.reshape(N, T * D)
    targ2 = targ.reshape(N, T * D)

    # Ship everything the scalar tail needs as one tiny SMEM vector.
    b = jnp.asarray(beta, jnp.float32)
    g = jnp.asarray(gamma, jnp.float32)
    a = jnp.asarray(alpha, jnp.float32)
    scal = jnp.stack([b, g, jnp.exp(-b), jnp.exp(-g), a])

    kernel = functools.partial(_paper_criterion_kernel, N=N, T=T, width=width)
    out = pl.pallas_call(
        kernel,
        out_shape=jax.ShapeDtypeStruct((1, 1), jnp.float32),
        in_specs=[
            pl.BlockSpec(memory_space=pltpu.MemorySpace.VMEM),  # pred (full block)
            pl.BlockSpec(memory_space=pltpu.MemorySpace.VMEM),  # targ (full block)
            pl.BlockSpec(memory_space=pltpu.MemorySpace.SMEM),  # [b, g, e^-b, e^-g, alpha]
        ],
        out_specs=pl.BlockSpec(memory_space=pltpu.MemorySpace.VMEM),
    )(pred2, targ2, scal)
    return out[0, 0]


def paper_criterion_ref(pred, targ, beta, gamma, alpha):
    """Pure-JAX reference, a literal transcription of the PyTorch forward."""
    N, T, D = pred.shape
    num_poses = N * T
    l1 = lambda a, b: jnp.mean(jnp.abs(a - b))
    p2 = pred.reshape(num_poses, -1)
    t2 = targ.reshape(num_poses, -1)
    abs_loss = (jnp.exp(-beta) * l1(p2[:, :3], t2[:, :3]) + beta
                + jnp.exp(-gamma) * l1(p2[:, 3:], t2[:, 3:]) + gamma)
    pvos = pred[:, 1:, :] - pred[:, :-1, :]     # calc_vos_simple
    tvos = targ[:, 1:, :] - targ[:, :-1, :]
    pv2 = pvos.reshape(num_poses, -1)
    tv2 = tvos.reshape(num_poses, -1)
    rel_loss = (jnp.exp(-beta) * l1(pv2[:, :3], tv2[:, :3]) + beta
                + jnp.exp(-gamma) * l1(pv2[:, 3:], tv2[:, 3:]) + gamma)
    return abs_loss + alpha * rel_loss


if __name__ == "__main__":
    key = jax.random.PRNGKey(0)
    k1, k2 = jax.random.split(key)
    # N x T x 6 poses; T=3 so the module's .view(N*T, -1) on the vos tensor is valid.
    N, T, D = 2, 3, 6
    pred = jax.random.normal(k1, (N, T, D), dtype=jnp.float32)
    targ = jax.random.normal(k2, (N, T, D), dtype=jnp.float32)

    # Module defaults for the (non-learned) parameters.
    beta, gamma, alpha = 0.0, -3.0, 1.0

    loss = paper_criterion(pred, targ, beta=beta, gamma=gamma, alpha=alpha)
    loss = jax.block_until_ready(loss)

    ref = paper_criterion_ref(pred, targ, beta, gamma, alpha)
    assert jnp.allclose(loss, ref, rtol=1e-5, atol=1e-5), (loss, ref)
    print("KERNEL_OK")
</pallas_src>

<mosaic_0001>
module attributes {stable_mosaic.version = 11 : i64} {
  func.func @_paper_criterion_kernel(%arg0: memref<2x18xf32, #tpu.memory_space<vmem>>, %arg1: memref<2x18xf32, #tpu.memory_space<vmem>>, %arg2: memref<5xf32, #tpu.memory_space<smem>>, %arg3: memref<1x1xf32, #tpu.memory_space<vmem>>) attributes {dimension_semantics = [], scalar_prefetch = 0 : i64, scratch_operands = 0 : i64, tpu.core_type = #tpu.core_type<tc>} {
    %c0 = arith.constant 0 : index
    %c0_0 = arith.constant 0 : index
    %0 = vector.load %arg0[%c0, %c0_0] : memref<2x18xf32, #tpu.memory_space<vmem>>, vector<2x18xf32>
    %c0_1 = arith.constant 0 : index
    %c0_2 = arith.constant 0 : index
    %1 = vector.load %arg1[%c0_1, %c0_2] : memref<2x18xf32, #tpu.memory_space<vmem>>, vector<2x18xf32>
    %2 = arith.subf %0, %1 : vector<2x18xf32>
    %3 = math.absf %2 : vector<2x18xf32>
    %4 = tpu.iota {dimensions = array<i32: 1>} : vector<2x18xi32>
    %cst = arith.constant 0.000000e+00 : f32
    %5 = vector.broadcast %cst : f32 to vector<2x18xf32>
    %c0_i32 = arith.constant 0 : i32
    %6 = vector.broadcast %c0_i32 : i32 to vector<2x18xi32>
    %7 = arith.cmpi sge, %4, %6 : vector<2x18xi32>
    %c3_i32 = arith.constant 3 : i32
    %8 = vector.broadcast %c3_i32 : i32 to vector<2x18xi32>
    %9 = arith.cmpi slt, %4, %8 : vector<2x18xi32>
    %10 = arith.andi %7, %9 : vector<2x18xi1>
    %11 = arith.extui %10 : vector<2x18xi1> to vector<2x18xi32>
    %12 = arith.sitofp %11 : vector<2x18xi32> to vector<2x18xf32>
    %13 = arith.addf %5, %12 : vector<2x18xf32>
    %c6_i32 = arith.constant 6 : i32
    %14 = vector.broadcast %c6_i32 : i32 to vector<2x18xi32>
    %15 = arith.cmpi sge, %4, %14 : vector<2x18xi32>
    %c9_i32 = arith.constant 9 : i32
    %16 = vector.broadcast %c9_i32 : i32 to vector<2x18xi32>
    %17 = arith.cmpi slt, %4, %16 : vector<2x18xi32>
    %18 = arith.andi %15, %17 : vector<2x18xi1>
    %19 = arith.extui %18 : vector<2x18xi1> to vector<2x18xi32>
    %20 = arith.sitofp %19 : vector<2x18xi32> to vector<2x18xf32>
    %21 = arith.addf %13, %20 : vector<2x18xf32>
    %c12_i32 = arith.constant 12 : i32
    %22 = vector.broadcast %c12_i32 : i32 to vector<2x18xi32>
    %23 = arith.cmpi sge, %4, %22 : vector<2x18xi32>
    %c15_i32 = arith.constant 15 : i32
    %24 = vector.broadcast %c15_i32 : i32 to vector<2x18xi32>
    %25 = arith.cmpi slt, %4, %24 : vector<2x18xi32>
    %26 = arith.andi %23, %25 : vector<2x18xi1>
    %27 = arith.extui %26 : vector<2x18xi1> to vector<2x18xi32>
    %28 = arith.sitofp %27 : vector<2x18xi32> to vector<2x18xf32>
    %29 = arith.addf %21, %28 : vector<2x18xf32>
    %30 = vector.shape_cast %3 : vector<2x18xf32> to vector<1x2x18xf32>
    %cst_3 = arith.constant dense<0.000000e+00> : vector<1xf32>
    %31 = vector.multi_reduction <add>, %30, %cst_3 [1, 2] : vector<1x2x18xf32> to vector<1xf32>
    %32 = vector.shape_cast %31 : vector<1xf32> to vector<1x1x1xf32>
    %33 = vector.extract %32[0, 0, 0] : f32 from vector<1x1x1xf32>
    %34 = arith.mulf %3, %29 : vector<2x18xf32>
    %35 = vector.shape_cast %34 : vector<2x18xf32> to vector<1x2x18xf32>
    %cst_4 = arith.constant dense<0.000000e+00> : vector<1xf32>
    %36 = vector.multi_reduction <add>, %35, %cst_4 [1, 2] : vector<1x2x18xf32> to vector<1xf32>
    %37 = vector.shape_cast %36 : vector<1xf32> to vector<1x1x1xf32>
    %38 = vector.extract %37[0, 0, 0] : f32 from vector<1x1x1xf32>
    %cst_5 = arith.constant 0.055555556 : f32
    %39 = arith.mulf %38, %cst_5 : f32
    %40 = arith.subf %33, %38 : f32
    %cst_6 = arith.constant 0.055555556 : f32
    %41 = arith.mulf %40, %cst_6 : f32
    %42 = vector.extract_strided_slice %2 {offsets = [0, 6], sizes = [2, 12], strides = [1, 1]} : vector<2x18xf32> to vector<2x12xf32>
    %43 = vector.extract_strided_slice %2 {offsets = [0, 0], sizes = [2, 12], strides = [1, 1]} : vector<2x18xf32> to vector<2x12xf32>
    %44 = arith.subf %42, %43 : vector<2x12xf32>
    %45 = math.absf %44 : vector<2x12xf32>
    %46 = tpu.iota {dimensions = array<i32: 1>} : vector<2x12xi32>
    %cst_7 = arith.constant 0.000000e+00 : f32
    %47 = vector.broadcast %cst_7 : f32 to vector<2x12xf32>
    %c0_i32_8 = arith.constant 0 : i32
    %48 = vector.broadcast %c0_i32_8 : i32 to vector<2x12xi32>
    %49 = arith.cmpi sge, %46, %48 : vector<2x12xi32>
    %c3_i32_9 = arith.constant 3 : i32
    %50 = vector.broadcast %c3_i32_9 : i32 to vector<2x12xi32>
    %51 = arith.cmpi slt, %46, %50 : vector<2x12xi32>
    %52 = arith.andi %49, %51 : vector<2x12xi1>
    %53 = arith.extui %52 : vector<2x12xi1> to vector<2x12xi32>
    %54 = arith.sitofp %53 : vector<2x12xi32> to vector<2x12xf32>
    %55 = arith.addf %47, %54 : vector<2x12xf32>
    %c4_i32 = arith.constant 4 : i32
    %56 = vector.broadcast %c4_i32 : i32 to vector<2x12xi32>
    %57 = arith.cmpi sge, %46, %56 : vector<2x12xi32>
    %c7_i32 = arith.constant 7 : i32
    %58 = vector.broadcast %c7_i32 : i32 to vector<2x12xi32>
    %59 = arith.cmpi slt, %46, %58 : vector<2x12xi32>
    %60 = arith.andi %57, %59 : vector<2x12xi1>
    %61 = arith.extui %60 : vector<2x12xi1> to vector<2x12xi32>
    %62 = arith.sitofp %61 : vector<2x12xi32> to vector<2x12xf32>
    %63 = arith.addf %55, %62 : vector<2x12xf32>
    %c8_i32 = arith.constant 8 : i32
    %64 = vector.broadcast %c8_i32 : i32 to vector<2x12xi32>
    %65 = arith.cmpi sge, %46, %64 : vector<2x12xi32>
    %c11_i32 = arith.constant 11 : i32
    %66 = vector.broadcast %c11_i32 : i32 to vector<2x12xi32>
    %67 = arith.cmpi slt, %46, %66 : vector<2x12xi32>
    %68 = arith.andi %65, %67 : vector<2x12xi1>
    %69 = arith.extui %68 : vector<2x12xi1> to vector<2x12xi32>
    %70 = arith.sitofp %69 : vector<2x12xi32> to vector<2x12xf32>
    %71 = arith.addf %63, %70 : vector<2x12xf32>
    %72 = vector.shape_cast %45 : vector<2x12xf32> to vector<1x2x12xf32>
    %cst_10 = arith.constant dense<0.000000e+00> : vector<1xf32>
    %73 = vector.multi_reduction <add>, %72, %cst_10 [1, 2] : vector<1x2x12xf32> to vector<1xf32>
    %74 = vector.shape_cast %73 : vector<1xf32> to vector<1x1x1xf32>
    %75 = vector.extract %74[0, 0, 0] : f32 from vector<1x1x1xf32>
    %76 = arith.mulf %45, %71 : vector<2x12xf32>
    %77 = vector.shape_cast %76 : vector<2x12xf32> to vector<1x2x12xf32>
    %cst_11 = arith.constant dense<0.000000e+00> : vector<1xf32>
    %78 = vector.multi_reduction <add>, %77, %cst_11 [1, 2] : vector<1x2x12xf32> to vector<1xf32>
    %79 = vector.shape_cast %78 : vector<1xf32> to vector<1x1x1xf32>
    %80 = vector.extract %79[0, 0, 0] : f32 from vector<1x1x1xf32>
    %cst_12 = arith.constant 0.055555556 : f32
    %81 = arith.mulf %80, %cst_12 : f32
    %82 = arith.subf %75, %80 : f32
    %cst_13 = arith.constant 0.166666672 : f32
    %83 = arith.mulf %82, %cst_13 : f32
    %c0_14 = arith.constant 0 : index
    %84 = memref.load %arg2[%c0_14] : memref<5xf32, #tpu.memory_space<smem>>
    %c1 = arith.constant 1 : index
    %85 = memref.load %arg2[%c1] : memref<5xf32, #tpu.memory_space<smem>>
    %c2 = arith.constant 2 : index
    %86 = memref.load %arg2[%c2] : memref<5xf32, #tpu.memory_space<smem>>
    %c3 = arith.constant 3 : index
    %87 = memref.load %arg2[%c3] : memref<5xf32, #tpu.memory_space<smem>>
    %c4 = arith.constant 4 : index
    %88 = memref.load %arg2[%c4] : memref<5xf32, #tpu.memory_space<smem>>
    %89 = arith.mulf %86, %39 : f32
    %90 = arith.addf %89, %84 : f32
    %91 = arith.mulf %87, %41 : f32
    %92 = arith.addf %90, %91 : f32
    %93 = arith.addf %92, %85 : f32
    %94 = arith.mulf %86, %81 : f32
    %95 = arith.addf %94, %84 : f32
    %96 = arith.mulf %87, %83 : f32
    %97 = arith.addf %95, %96 : f32
    %98 = arith.addf %97, %85 : f32
    %99 = arith.mulf %88, %98 : f32
    %100 = arith.addf %93, %99 : f32
    %101 = vector.broadcast %100 : f32 to vector<1x1xf32>
    %c0_15 = arith.constant 0 : index
    %c0_16 = arith.constant 0 : index
    %102 = vector.load %arg3[%c0_15, %c0_16] : memref<1x1xf32, #tpu.memory_space<vmem>>, vector<1x1xf32>
    tpu.vector_store %arg3[%c0_15, %c0_16], %101 {strides = array<i32>} : memref<1x1xf32, #tpu.memory_space<vmem>>, vector<1x1xf32>,
    return
  }
}

</mosaic_0001>

<bundles_post_ra>
// kernel: tpu_custom_call.1
= control target key start
LH: loop header
LB: loop body
LE: loop exit
PB: predicated region body
PF: predicated region fallthrough
CT: control target
= control target key end

     0   :  { %8 = vsyncpa [#allocation3], 0  ;;  %s336_s0 = inlined_call_operand.hbm [shape: f32[2,18], index: 0, kind: input, shape index: {}]   ;;  %s337_s1 = inlined_call_operand.hbm [shape: f32[2,18], index: 1, kind: input, shape index: {}]   ;;  %s338_s2 = inlined_call_operand.vmem [shape: f32[5], index: 2, kind: input, shape index: {}]   ;;  %s339_s3 = inlined_call_operand.hbm [shape: f32[1,1], index: 3, kind: output, shape index: {}]  }
   0x1   :  { %9 = vsyncpa [#allocation7], 0 }
   0x2   :  { %10 = vsyncpa [#allocation5], 0 }
   0x3   :  { %11 = vsyncpa [#allocation4], 0  ;;  %s297_s12 = smov [#allocation2]   ;;  %s298_s14 = smov [#allocation6]  }
   0x4   :  { %s18_s13 = sshll.u32 %s297_s12, 4  ;;  %s28_s15 = sshll.u32 %s298_s14, 4  ;;  %s19_s13 = int_to_ptr.vmem [resolvable:$true] %s18_s13  ;;  %s29_s15 = int_to_ptr.vmem [resolvable:$true] %s28_s15 }
   0x5   :  { %s225_s16 = scalar_lea.vmem %s19_s13, 32  ;;  %p230_p1 = scmp.lt.s32.totalorder %s19_s13, %s19_s13 }
   0x6   :  { %p226_p0 = scmp.ne.s32.totalorder %s19_s13, %s225_s16  ;;  %p231_p2 = scmp.lt.s32.totalorder %s225_s16, %s225_s16 }
   0x8   :  { %p232_p3 = por %p231_p2, %p230_p1 }
   0xa   :  { %p233_p4 = pnand %p232_p3, %p226_p0 }
   0xc   :  { %236 = shalt.err (!%p233_p4)
}
   0xd   :  { %21 = dma.hbm_to_vmem [thread:$0]  %s336_s0, 32, %s19_s13, [#allocation3]  }
   0xe   :  { %s245_s19 = scalar_lea.vmem %s29_s15, 32  ;;  %p250_p6 = scmp.lt.s32.totalorder %s29_s15, %s29_s15 }
   0xf   :  { %p246_p5 = scmp.ne.s32.totalorder %s29_s15, %s245_s19  ;;  %p251_p7 = scmp.lt.s32.totalorder %s245_s19, %s245_s19 }
  0x11   :  { %p252_p8 = por %p251_p7, %p250_p6 }
  0x13   :  { %p253_p9 = pnand %p252_p8, %p246_p5 }
  0x15   :  { %256 = shalt.err (!%p253_p9)
}
  0x16   :  { %31 = dma.hbm_to_vmem [thread:$0]  %s337_s1, 32, %s29_s15, [#allocation7]  }
  0x17   :  { %s38_s24 = sshll.u32 %s338_s2, 4  ;;  %s39_s24 = int_to_ptr.vmem [resolvable:$true] %s38_s24 }
  0x18   :  { %s257_s25 = scalar_lea.vmem %s39_s24, 16  ;;  %p262_p11 = scmp.lt.s32.totalorder %s39_s24, %s39_s24 }
  0x19   :  { %p258_p10 = scmp.ne.s32.totalorder %s39_s24, %s257_s25  ;;  %p263_p12 = scmp.lt.s32.totalorder %s257_s25, %s257_s25 }
  0x1b   :  { %p264_p13 = por %p263_p12, %p262_p11 }
  0x1d   :  { %p265_p0 = pnand %p264_p13, %p258_p10 }
  0x1f   :  { %268 = shalt.err (!%p265_p0)
}
  0x20   :  { %s299_s0 = smov [#allocation8]  }
  0x21   :  { %41 = dma.vmem_to_smem %s39_s24, 16, %s299_s0, [#allocation5]  }
  0x22   :  { %289 = dma.done.wait [#allocation3], 32  }
  0x23   :  { %290 = vsyncadd [#allocation3], 4294967264 }
  0x24   :  { %291 = dma.done.wait [#allocation7], 32  }
  0x25   :  { %292 = vsyncadd [#allocation7], 4294967264 }
  0x26   :  { %293 = dma.done.wait [#allocation5], 16  }
  0x27   :  { %294 = vsyncadd [#allocation5], 4294967280 }
  0x28   :  { %51 = sfence }
  0x29   :  { %v52_v0 = vld [vmem:[#allocation2] sm:$0x3]  ;;  %v53_v1 = vld [vmem:[#allocation6] sm:$0x3]  ;;  %v56_v2 = vlaneseq  ;;  %s300_s1 = smov 6   ;;  %v301_v5 = vmov 0.0  }
  0x2a   :  { %v54_v3 = vsub.f32 %v52_v0, %v53_v1  ;;  %vm76_vm13 = vcmask 140288   ;;  %s302_s2 = smov 122   ;;  %vm123_vm14 = vcmask 91136   ;;  %s199_s28 = sld [smem:[#allocation8 + $0x2]]  ;;  %vm174_vm15 = vcmask 0  }
  0x2b   :  { %v57_v4 = vand.u32 127, %v56_v2  ;;  %s200_s29 = sld [smem:[#allocation8 + $0x3]]  ;;  %s303_s23 = smov [#allocation9]  }
  0x2c   :  { %102 = vrot.lane.b32.xlu0 %v54_v3, %s300_s1  ;;  %v55_v12 = vand.u32 2147483647, %v54_v3  ;;  %s156_s5 = sld [smem:[#allocation8]]  ;;  %s182_s24 = sshll.u32 %s303_s23, 4  ;;  %s183_s24 = int_to_ptr.vmem [resolvable:$true] %s182_s24 }
  0x2d   :  { %vm59_vm0 = vcmp.lt.s32.totalorder %v57_v4, 3  ;;  %vm107_vm1 = vcmp.ge.s32.totalorder %v57_v4, 4  ;;  %vm108_vm2 = vcmp.lt.s32.totalorder %v57_v4, 7  ;;  %vm113_vm3 = vcmp.ge.s32.totalorder %v57_v4, 8  ;;  %s198_s13 = sld [smem:[#allocation8 + $0x1]]  ;;  %p274_p2 = scmp.lt.s32.totalorder %s183_s24, %s183_s24 }
  0x2e   :  { %v193_v6 = vsel %vm59_vm0, 1.0, %v301_v5  ;;  %vm109_vm4 = vmand %vm107_vm1, %vm108_vm2  ;;  %vm114_vm5 = vcmp.lt.s32.totalorder %v57_v4, 11  ;;  %vm64_vm6 = vcmp.ge.s32.totalorder %v57_v4, 6  ;;  %vm65_vm7 = vcmp.lt.s32.totalorder %v57_v4, 9  ;;  %s201_s17 = sld [smem:[#allocation8 + $0x4]] }
  0x2f   :  { %v196_v7 = vsel %vm109_vm4, 1.0, %v301_v5  ;;  %vm115_vm8 = vmand %vm113_vm3, %vm114_vm5  ;;  %vm70_vm9 = vcmp.ge.s32.totalorder %v57_v4, 12  ;;  %vm71_vm10 = vcmp.lt.s32.totalorder %v57_v4, 15  ;;  %v77_v18 = vsel %vm76_vm13, %v55_v12, 0.0 }
  0x30   :  { %v112_v8 = vadd.f32 %v196_v7, %v193_v6  ;;  %v197_v9 = vsel %vm115_vm8, 1.0, %v301_v5  ;;  %vm66_vm11 = vmand %vm64_vm6, %vm65_vm7 }
  0x31   :  { %v194_v10 = vsel %vm66_vm11, 1.0, %v301_v5  ;;  %vm72_vm12 = vmand %vm70_vm9, %vm71_vm10 }
  0x32   :  { %v118_v11 = vadd.f32 %v197_v9, %v112_v8  ;;  %v69_v13 = vadd.f32 %v194_v10, %v193_v6  ;;  %v195_v14 = vsel %vm72_vm12, 1.0, %v301_v5 }
  0x34   :  { %135 = vrot.lane.b32.xlu0 %v118_v11, %s300_s1  ;;  %v75_v15 = vadd.f32 %v195_v14, %v69_v13 }
  0x36   :  { %v87_v16 = vmul.f32 %v75_v15, %v55_v12 }
  0x38   :  { %v88_v17 = vsel %vm76_vm13, %v87_v16, 0.0 }
  0x53   :  { %78 = vadd.xlane.f32.xlu0 %v77_v18 }
  0x9e   :  { %v103_v19 = vpop.permute.xlu0 %102 }
  0x9f   :  { %v105_v20 = vsub.f32 %v54_v3, %v103_v19 }
  0xa1   :  { %v106_v21 = vand.u32 2147483647, %v105_v20 }
  0xa3   :  { %120 = vrot.lane.b32.xlu1 %v106_v21, %s302_s2 }
  0xa6   :  { %v136_v22 = vpop.permute.xlu0 %135 }
  0xa7   :  { %v138_v23 = vmul.f32 %v136_v22, %v106_v21 }
  0xa9   :  { %140 = vrot.lane.b32.xlu1 %v138_v23, %s302_s2  ;;  %s269_s2 = scalar_lea.vmem %s183_s24, 16 }
  0xaa   :  { %p270_p1 = scmp.ne.s32.totalorder %s183_s24, %s269_s2 }
  0xcd   :  { %89 = vadd.xlane.f32.xlu1 %v88_v17 }
  0xdc   :  { %v79_v24 = vpop.xlane.xlu0 %78 }
  0xdd   :  { %v80_v25 = vrot.slane %v79_v24, 4 }
  0xdf   :  { %v81_v28 = vadd.f32 %v80_v25, %v79_v24 }
  0xe1   :  { %v82_v30 = vrot.slane %v81_v28, 2 }
  0xe3   :  { %v83_v32 = vadd.f32 %v82_v30, %v81_v28 }
  0xe5   :  { %v84_v33 = vrot.slane %v83_v32, 1 }
  0xe7   :  { %v85_v34 = vadd.f32 %v84_v33, %v83_v32 }
  0xe9   :  { %202 = vpush %v85_v34 }
 0x115   :  { %v121_v26 = vpop.permute.xlu1 %120 }
 0x116   :  { %v124_v27 = vsel %vm123_vm14, %v121_v26, 0.0 }
 0x117   :  { %125 = vadd.xlane.f32.xlu0 %v124_v27 }
 0x11a   :  { %s203_s26 = spop %202 }
 0x11b   :  { %v141_v29 = vpop.permute.xlu1 %140 }
 0x11c   :  { %v143_v31 = vsel %vm123_vm14, %v141_v29, 0.0 }
 0x11d   :  { %144 = vadd.xlane.f32.xlu0 %v143_v31 }
 0x156   :  { %v90_v35 = vpop.xlane.xlu1 %89 }
 0x157   :  { %v91_v36 = vrot.slane %v90_v35, 4 }
 0x159   :  { %v92_v37 = vadd.f32 %v91_v36, %v90_v35 }
 0x15b   :  { %v93_v38 = vrot.slane %v92_v37, 2 }
 0x15d   :  { %v94_v39 = vadd.f32 %v93_v38, %v92_v37 }
 0x15f   :  { %v95_v40 = vrot.slane %v94_v39, 1 }
 0x161   :  { %v96_v41 = vadd.f32 %v95_v40, %v94_v39 }
 0x163   :  { %204 = vpush %v96_v41 }
 0x194   :  { %s205_s27 = spop %204 }
 0x195   :  { %s99_s30 = ssub.f32 %s203_s26, %s205_s27  ;;  %s98_s4 = smul.f32 0.055555556, %s205_s27 }
 0x196   :  { %s273_s26 = scalar_lea.vmem %s183_s24, 32 }
 0x197   :  { %s100_s6 = smul.f32 0.055555556, %s99_s30  ;;  %p275_p3 = scmp.lt.s32.totalorder %s273_s26, %s269_s2 }
 0x198   :  { %s161_s7 = smul.f32 %s199_s28, %s98_s4 }
 0x199   :  { %s163_s12 = smul.f32 %s200_s29, %s100_s6  ;;  %p276_p4 = por %p275_p3, %p274_p2 }
 0x19a   :  { %s162_s14 = sadd.f32 %s161_s7, %s156_s5 }
 0x19b   :  { %p277_p5 = pnand %p276_p4, %p270_p1 }
 0x19c   :  { %s164_s20 = sadd.f32 %s163_s12, %s162_s14 }
 0x19e   :  { %s165_s25 = sadd.f32 %s198_s13, %s164_s20 }
 0x1a0   :  { %v126_v42 = vpop.xlane.xlu0 %125 }
 0x1a1   :  { %v127_v43 = vrot.slane %v126_v42, 4 }
 0x1a3   :  { %v128_v44 = vadd.f32 %v127_v43, %v126_v42 }
 0x1a5   :  { %v129_v45 = vrot.slane %v128_v44, 2 }
 0x1a6   :  { %v145_v46 = vpop.xlane.xlu0 %144 }
 0x1a7   :  { %v146_v47 = vrot.slane %v145_v46, 4  ;;  %v130_v48 = vadd.f32 %v129_v45, %v128_v44 }
 0x1a9   :  { %v147_v49 = vadd.f32 %v146_v47, %v145_v46  ;;  %v131_v50 = vrot.slane %v130_v48, 1 }
 0x1ab   :  { %v148_v51 = vrot.slane %v147_v49, 2  ;;  %v132_v52 = vadd.f32 %v131_v50, %v130_v48 }
 0x1ad   :  { %v149_v53 = vadd.f32 %v148_v51, %v147_v49  ;;  %206 = vpush %v132_v52 }
 0x1af   :  { %v150_v54 = vrot.slane %v149_v53, 1 }
 0x1b1   :  { %v151_v55 = vadd.f32 %v150_v54, %v149_v53 }
 0x1b3   :  { %208 = vpush %v151_v55 }
 0x1de   :  { %s207_s8 = spop %206 }
 0x1e4   :  { %s209_s9 = spop %208 }
 0x1e5   :  { %s153_s10 = smul.f32 0.055555556, %s209_s9  ;;  %s154_s11 = ssub.f32 %s207_s8, %s209_s9 }
 0x1e7   :  { %s155_s15 = smul.f32 0.16666667, %s154_s11 }
 0x1e8   :  { %s166_s16 = smul.f32 %s199_s28, %s153_s10 }
 0x1e9   :  { %s168_s18 = smul.f32 %s200_s29, %s155_s15 }
 0x1ea   :  { %s167_s19 = sadd.f32 %s166_s16, %s156_s5 }
 0x1ec   :  { %s169_s21 = sadd.f32 %s168_s18, %s167_s19 }
 0x1ee   :  { %s170_s22 = sadd.f32 %s198_s13, %s169_s21 }
 0x1f0   :  { %s171_s0 = smul.f32 %s201_s17, %s170_s22 }
 0x1f2   :  { %s172_s1 = sadd.f32 %s171_s0, %s165_s25 }
 0x1f4   :  { %v173_v56 = vstv %s172_s1 }
 0x1f5   :  { %175 = vst.msk [vmem:[#allocation9] sm:$0x1] %vm174_vm15, %v173_v56 }
 0x1f6   :  { %280 = shalt.err (!%p277_p5)
}
 0x1f7   :  { %185 = dma.vmem_to_hbm [thread:$0]  %s183_s24, 16, %s339_s3, [#allocation4]  }
 0x1f8   :  { %295 = dma.done.wait [#allocation4], 16  }
 0x1f9   :  { %296 = vsyncadd [#allocation4], 4294967280 }
 0x1fa   :  { %189 = vsyncpa [#allocation3], 1 }
 0x1fb   :  { %190 = vsyncpa [#allocation7], 1 }
 0x1fc   :  { %191 = vsyncpa [#allocation4], 1 }
 0x1fd   :  { %192 = vsyncpa [#allocation5], 1 }

</bundles_post_ra>
